<compile_context>
chip_gen: v7x
topology: tpu7x:2x2x1
jax: 0.10.0
libtpu: 0.0.40
codegen_flags: <defaults>
</compile_context>

<pallas_src>
import functools

import jax
import jax.numpy as jnp
from jax.experimental import pallas as pl
from jax.experimental.pallas import tpu as pltpu


def _round_up(v, m):
    return ((v + m - 1) // m) * m


def _row_to_col(row):
    """[1, N] -> [N, 1] without jnp.transpose (VPU select + lane reduce)."""
    n = row.shape[1]
    r = jax.lax.broadcasted_iota(jnp.int32, (n, n), 0)
    c = jax.lax.broadcasted_iota(jnp.int32, (n, n), 1)
    return jnp.sum(jnp.where(r == c, row, 0.0), axis=1, keepdims=True)


# ----------------------------------------------------------------------------
# Pallas kernel
# ----------------------------------------------------------------------------
def _locator_kernel(compute_learned, use_external, h_valid,
                    # inputs (node-streamed, then resident weights)
                    h_ref, batch_ref, attn_ref,
                    score_wt_ref, score_b_ref,
                    w1c_ref, b1c_ref, ln_g_ref, ln_b_ref,
                    w2_ref, w3_ref, b3_ref, cw2_ref, cb2_ref,
                    # outputs (lane/sublane padded)
                    flat_ref, coords_ref,
                    # scratch (persist across grid steps)
                    gmax_ref, gsum_ref, pnum_ref):
    step = pl.program_id(0)
    last = pl.num_programs(0) - 1
    tile_bn = h_ref.shape[0]
    bp = gmax_ref.shape[1]

    @pl.when(step == 0)
    def _init():
        gmax_ref[...] = jnp.full(gmax_ref.shape, -3.0e38, jnp.float32)
        gsum_ref[...] = jnp.zeros(gsum_ref.shape, jnp.float32)
        pnum_ref[...] = jnp.zeros(pnum_ref.shape, jnp.float32)

    h_bf = h_ref[...]                                   # [T, H] bf16 (HBM feed)
    h = h_bf.astype(jnp.float32)                        # f32 for the VPU path
    batch_col = batch_ref[...]                          # [T, 1] int32 (-1 = pad)

    # ---- attention score alpha ---------------------------------------------
    if compute_learned:
        learned = (jnp.sum(h * score_wt_ref[...], axis=1, keepdims=True)
                   + score_b_ref[...])                  # [T, 1]
    if use_external:
        alpha = (learned + attn_ref[...]) if compute_learned else attn_ref[...]
    else:
        alpha = learned                                 # [T, 1]

    # ---- online scatter-softmax over the streamed node axis -----------------
    g_iota = jax.lax.broadcasted_iota(jnp.int32, (tile_bn, bp), 1)
    mask = g_iota == batch_col                          # [T, BP] one-hot rows

    neg_big = jnp.float32(-3.0e38)                      # finite sentinel, no 0*inf
    tile_max = jnp.max(jnp.where(mask, alpha, neg_big), axis=0, keepdims=True)
    old_max = gmax_ref[...]
    new_max = jnp.maximum(old_max, tile_max)            # [1, BP]
    scale = jnp.exp(old_max - new_max)                  # [1, BP] rescale factor

    node_max = jnp.sum(jnp.where(mask, new_max, 0.0), axis=1, keepdims=True)
    e = jnp.exp(alpha - node_max)                       # [T, 1], <= 1 for real nodes

    tile_sum = jnp.sum(jnp.where(mask, e, 0.0), axis=0, keepdims=True)
    gsum_ref[...] = scale * gsum_ref[...] + tile_sum    # [1, BP]
    gmax_ref[...] = new_max

    # un-normalised pooled numerator: single bf16 MXU contraction over nodes
    mask_bf = mask.astype(jnp.bfloat16)                 # 0/1 exact in bf16
    eh_bf = (e * h).astype(jnp.bfloat16)                # [T, H]
    tile_pooled = jax.lax.dot_general(
        mask_bf, eh_bf, dimension_numbers=(((0,), (0,)), ((), ())),
        preferred_element_type=jnp.float32)             # [BP, H]
    pnum_ref[...] = pnum_ref[...] * _row_to_col(scale) + tile_pooled

    # ---- finalize: group-side normalisation + heads (runs once) -------------
    @pl.when(step == last)
    def _finalize():
        gsum = gsum_ref[...]                            # >= 1 for non-empty groups
        safe = jnp.where(gsum > 0.0, gsum, 1.0)         # empty group -> pooled row 0
        pooled = pnum_ref[...] * _row_to_col(pl.reciprocal(safe))   # [BP, H]

        # fused first projections of loc_head and coord_head (halves lane-padded)
        tc = (jnp.dot(pooled, w1c_ref[...], preferred_element_type=jnp.float32)
              + b1c_ref[...])                           # [BP, 2*H_pad]
        h_pad = tc.shape[1] // 2
        t = tc[:, :h_pad]                               # vreg-aligned split
        c = tc[:, h_pad:]

        # LayerNorm over the h_valid real features; padded lanes are exactly 0,
        # so sum / sumsq over all lanes divided by h_valid is exact.
        inv_h = jnp.float32(1.0 / h_valid)
        mu = jnp.sum(t, axis=-1, keepdims=True) * inv_h
        ex2 = jnp.sum(t * t, axis=-1, keepdims=True) * inv_h
        var = ex2 - mu * mu
        t = (t - mu) * jax.lax.rsqrt(var + 1e-5) * ln_g_ref[...] + ln_b_ref[...]
        t = jnp.maximum(t, 0.0)
        # TODO(synk): Dropout(0.2) is identity in eval mode; training-mode RNG
        # dropout is not implemented.
        t = jnp.maximum(jnp.dot(t, w2_ref[...],
                                preferred_element_type=jnp.float32), 0.0)  # [BP, R]
        flat_ref[...] = jax.nn.sigmoid(
            jnp.dot(t, w3_ref[...], preferred_element_type=jnp.float32)
            + b3_ref[...])                              # [BP, P_pad]

        c = jnp.maximum(c, 0.0)
        coords_ref[...] = jax.nn.sigmoid(
            jnp.dot(c, cw2_ref[...], preferred_element_type=jnp.float32)
            + cb2_ref[...])                             # [BP, C_pad]


# ----------------------------------------------------------------------------
# Python wrapper
# ----------------------------------------------------------------------------
def heimdall_locator(x, batch, params, location_output_sizes, num_graphs,
                     attention_weights=None, hybrid_attention=False,
                     tile_bn=512):
    BN, H, _T = x.shape
    B = int(num_graphs)
    total_pixels = sum(hh * ww for (hh, ww) in location_output_sizes)
    R = params["w2"].shape[1]

    H_pad = _round_up(H, 128)
    P_pad = _round_up(total_pixels, 128)
    C_pad = 128
    BP = _round_up(B, 8)                      # group rows, sublane aligned

    TILE = min(int(tile_bn), _round_up(BN, 16))
    TILE = _round_up(TILE, 16)                # bf16 sublane tiling
    BN_pad = _round_up(BN, TILE)
    n_tiles = BN_pad // TILE

    # ---- hoist the time-mean to XLA; feed the kernel a bf16 copy of h -------
    h = jnp.mean(x.astype(jnp.float32), axis=2)                       # [BN, H]
    h_bf = jnp.pad(h.astype(jnp.bfloat16), ((0, BN_pad - BN), (0, 0)))

    batch_col = jnp.pad(batch.astype(jnp.int32).reshape(BN, 1),
                        ((0, BN_pad - BN), (0, 0)), constant_values=-1)
    if attention_weights is None:
        attn_col = jnp.zeros((BN_pad, 1), jnp.float32)
        use_external = False
    else:
        attn_col = jnp.pad(
            attention_weights.astype(jnp.float32).reshape(BN, 1),
            ((0, BN_pad - BN), (0, 0)))
        use_external = True
    compute_learned = (not use_external) or hybrid_attention

    # ---- parameter plumbing (trace-time layout; XLA const-folds) ------------
    def pad2(a, rows, cols):
        return jnp.pad(a, ((0, rows - a.shape[0]), (0, cols - a.shape[1])))

    score_wt = params["score_w"].reshape(1, H)
    w1c = jnp.concatenate([pad2(params["w1"], H, H_pad),
                           pad2(params["cw1"], H, H_pad)], axis=1)    # [H, 2*H_pad]
    b1c = jnp.concatenate([pad2(params["b1"], 1, H_pad),
                           pad2(params["cb1"], 1, H_pad)], axis=1)    # [1, 2*H_pad]
    ln_g = pad2(params["ln_g"], 1, H_pad)     # zero-padded -> padded lanes stay 0
    ln_b = pad2(params["ln_b"], 1, H_pad)
    w2p = pad2(params["w2"], H_pad, R)
    w3p = pad2(params["w3"], R, P_pad)
    b3p = pad2(params["b3"], 1, P_pad)
    cw2p = pad2(params["cw2"], H_pad, C_pad)
    cb2p = pad2(params["cb2"], 1, C_pad)

    weights = (score_wt, params["score_b"], w1c, b1c, ln_g, ln_b,
               w2p, w3p, b3p, cw2p, cb2p)

    node_specs = [
        pl.BlockSpec((TILE, H), lambda i: (i, 0)),        # h (bf16, streamed)
        pl.BlockSpec((TILE, 1), lambda i: (i, 0)),        # graph ids
        pl.BlockSpec((TILE, 1), lambda i: (i, 0)),        # external attention
    ]
    weight_specs = [pl.BlockSpec(w.shape, lambda i: (0, 0)) for w in weights]

    out_shape = (jax.ShapeDtypeStruct((BP, P_pad), jnp.float32),
                 jax.ShapeDtypeStruct((BP, C_pad), jnp.float32))
    out_specs = (pl.BlockSpec((BP, P_pad), lambda i: (0, 0)),
                 pl.BlockSpec((BP, C_pad), lambda i: (0, 0)))
    scratch_shapes = [pltpu.VMEM((1, BP), jnp.float32),   # running group max
                      pltpu.VMEM((1, BP), jnp.float32),   # running group sum
                      pltpu.VMEM((BP, H), jnp.float32)]   # pooled numerator

    # ---- VMEM budget: explicit estimate, capped at 75% of device VMEM -------
    weight_bytes = sum(int(w.size) * w.dtype.itemsize for w in weights)
    out_bytes = 4 * BP * (P_pad + C_pad)
    tile_bytes = TILE * (H * (2 + 4 + 2 + 4)              # h bf16/f32, e*h bf16/f32
                         + BP * (1 + 2 + 4 + 4)           # mask + where temporaries
                         + 3 * 4)                         # batch / attn / alpha cols
    head_bytes = 4 * BP * (2 * H_pad + R + P_pad + C_pad) + 4 * BP * BP
    scratch_bytes = 4 * (BP * H + 2 * BP)
    est = 2 * (tile_bytes + weight_bytes + out_bytes) + scratch_bytes + head_bytes
    try:
        vmem_cap = int(pltpu.get_tpu_info().vmem_capacity_bytes) * 3 // 4
    except Exception:  # conservative: fits v5e/v6e (128 MiB) and v7x (64 MiB)
        vmem_cap = 48 << 20
    vmem_limit = int(min(max(4 * est, 32 << 20), vmem_cap))

    flops = (2 * BN_pad * BP * H                          # one-hot pooled contraction
             + 2 * BP * H * 2 * H_pad                     # fused first projections
             + 2 * BP * H_pad * R + 2 * BP * R * P_pad + 2 * BP * H_pad * C_pad)
    transcendentals = BN_pad + 2 * n_tiles * BP + BP * (P_pad + C_pad + 1)
    bytes_accessed = 2 * BN_pad * H + 8 * BN_pad + weight_bytes + out_bytes

    kernel = functools.partial(_locator_kernel, compute_learned, use_external, H)

    flat_pad, coords_pad = pl.pallas_call(
        kernel,
        out_shape=out_shape,
        grid=(n_tiles,),
        in_specs=node_specs + weight_specs,
        out_specs=out_specs,
        scratch_shapes=scratch_shapes,
        compiler_params=pltpu.CompilerParams(
            dimension_semantics=("arbitrary",),           # carries accumulators
            vmem_limit_bytes=vmem_limit),
        cost_estimate=pl.CostEstimate(flops=int(flops),
                                      transcendentals=int(transcendentals),
                                      bytes_accessed=int(bytes_accessed)),
    )(h_bf, batch_col, attn_col, *weights)

    flat = flat_pad[:B, :total_pixels]
    coords = coords_pad[:B, :3]

    imgs, idx = [], 0
    for (hh, ww) in location_output_sizes:
        n = hh * ww
        imgs.append(flat[:, idx:idx + n].reshape(B, hh, ww))
        idx += n
    return imgs, coords


# ----------------------------------------------------------------------------
# Deterministic parameter construction (synthetic init, no checkpoint load)
# ----------------------------------------------------------------------------
def init_params(key, hidden, rank, total_pixels):
    ks = jax.random.split(key, 10)

    def lin_w(k, fan_in, fan_out):
        return (jax.random.normal(k, (fan_in, fan_out), jnp.float32)
                / jnp.sqrt(jnp.float32(fan_in)))

    return {
        "score_w": lin_w(ks[0], hidden, 1),
        "score_b": jnp.zeros((1, 1), jnp.float32),
        "w1": lin_w(ks[1], hidden, hidden),
        "b1": 0.01 * jax.random.normal(ks[2], (1, hidden), jnp.float32),
        "ln_g": jnp.ones((1, hidden), jnp.float32),   # PyTorch LayerNorm default
        "ln_b": jnp.zeros((1, hidden), jnp.float32),
        "w2": lin_w(ks[3], hidden, rank),             # bias=False
        "w3": lin_w(ks[4], rank, total_pixels),
        "b3": 0.01 * jax.random.normal(ks[5], (1, total_pixels), jnp.float32),
        "cw1": lin_w(ks[6], hidden, hidden),
        "cb1": 0.01 * jax.random.normal(ks[7], (1, hidden), jnp.float32),
        "cw2": lin_w(ks[8], hidden, 3),
        "cb2": 0.01 * jax.random.normal(ks[9], (1, 3), jnp.float32),
    }


# ----------------------------------------------------------------------------
# Pure-JAX f32 reference (correctness check, incl. external/hybrid attention)
# ----------------------------------------------------------------------------
def ref_forward(x, batch, params, location_output_sizes, num_graphs,
                attention_weights=None, hybrid_attention=False):
    h = x.astype(jnp.float32).mean(axis=2)
    learned = (h @ params["score_w"] + params["score_b"])[:, 0]
    if attention_weights is not None:
        alpha = (learned + attention_weights) if hybrid_attention else attention_weights
    else:
        alpha = learned
    gmax = jax.ops.segment_max(alpha, batch, num_segments=num_graphs)
    e = jnp.exp(alpha - gmax[batch])
    gsum = jax.ops.segment_sum(e, batch, num_segments=num_graphs)
    w = e / gsum[batch]
    pooled = jax.ops.segment_sum(h * w[:, None], batch, num_segments=num_graphs)

    t = pooled @ params["w1"] + params["b1"]
    mu = t.mean(axis=-1, keepdims=True)
    var = ((t - mu) ** 2).mean(axis=-1, keepdims=True)
    t = (t - mu) / jnp.sqrt(var + 1e-5) * params["ln_g"] + params["ln_b"]
    t = jax.nn.relu(t)
    t = jax.nn.relu(t @ params["w2"])
    flat = jax.nn.sigmoid(t @ params["w3"] + params["b3"])

    c = jax.nn.relu(pooled @ params["cw1"] + params["cb1"])
    coords = jax.nn.sigmoid(c @ params["cw2"] + params["cb2"])

    imgs, idx = [], 0
    for (hh, ww) in location_output_sizes:
        n = hh * ww
        imgs.append(flat[:, idx:idx + n].reshape(num_graphs, hh, ww))
        idx += n
    return imgs, coords


# ----------------------------------------------------------------------------
if __name__ == "__main__":
    hidden, T, rank = 32, 8, 16
    location_output_sizes = [(8, 8), (8, 8), (8, 8)]
    total_pixels = sum(hh * ww for (hh, ww) in location_output_sizes)

    key = jax.random.PRNGKey(0)
    kp, kx1, ka1, kx2, ka2 = jax.random.split(key, 5)
    params = init_params(kp, hidden, rank, total_pixels)

    # Mixed-precision tolerance: h is fed to the kernel in bf16 and the pooled
    # contraction uses bf16 MXU operands with f32 accumulation.
    RTOL = ATOL = 5e-3

    def check(x, batch, num_graphs, attention_weights, hybrid, tile, tag):
        imgs, coords = heimdall_locator(
            x, batch, params, location_output_sizes, num_graphs,
            attention_weights=attention_weights, hybrid_attention=hybrid,
            tile_bn=tile)
        jax.block_until_ready(coords)
        for im in imgs:
            jax.block_until_ready(im)
        ref_imgs, ref_coords = ref_forward(
            x, batch, params, location_output_sizes, num_graphs,
            attention_weights=attention_weights, hybrid_attention=hybrid)
        for a, b in zip(imgs, ref_imgs):
            assert a.shape == b.shape, f"{tag}: img shape mismatch"
            assert bool(jnp.all(jnp.isfinite(a))), f"{tag}: non-finite img"
            assert jnp.allclose(a, b, rtol=RTOL, atol=ATOL), f"{tag}: img mismatch"
        assert coords.shape == (num_graphs, 3), f"{tag}: coords shape"
        assert bool(jnp.all(jnp.isfinite(coords))), f"{tag}: non-finite coords"
        assert jnp.allclose(coords, ref_coords, rtol=RTOL, atol=ATOL), \
            f"{tag}: coords mismatch"

    # B = 2 graphs x 4 stations -> BN = 8 nodes (single tile).
    B1, N1 = 2, 4
    BN1 = B1 * N1
    x1 = jax.random.normal(kx1, (BN1, hidden, T), jnp.float32)
    batch1 = jnp.repeat(jnp.arange(B1, dtype=jnp.int32), N1)   # [0,0,0,0,1,1,1,1]
    attn1 = jax.random.normal(ka1, (BN1,), jnp.float32)

    check(x1, batch1, B1, None, False, 512, "learned-attn")
    check(x1, batch1, B1, attn1, False, 512, "external-attn")
    check(x1, batch1, B1, attn1, True, 512, "hybrid-attn")
    check(x1, batch1, B1 + 1, None, False, 512, "empty-group")  # trailing empty graph

    # B = 4 graphs x 16 stations, nodes interleaved across graphs, streamed in
    # 16-node tiles -> exercises the multi-step online-softmax accumulators.
    B2, N2 = 4, 16
    BN2 = B2 * N2
    x2 = jax.random.normal(kx2, (BN2, hidden, T), jnp.float32)
    batch2 = jnp.arange(BN2, dtype=jnp.int32) % B2
    attn2 = jax.random.normal(ka2, (BN2,), jnp.float32)

    check(x2, batch2, B2, None, False, 16, "multi-tile learned")
    check(x2, batch2, B2, attn2, True, 16, "multi-tile hybrid")

    print("KERNEL_OK")
</pallas_src>

<mosaic_0001>
module attributes {stable_mosaic.version = 11 : i64} {
  func.func @_locator_kernel(%arg0: i32, %arg1: memref<16x32xbf16, #tpu.memory_space<vmem>>, %arg2: memref<16x1xi32, #tpu.memory_space<vmem>>, %arg3: memref<16x1xf32, #tpu.memory_space<vmem>>, %arg4: memref<1x32xf32, #tpu.memory_space<vmem>>, %arg5: memref<1x1xf32, #tpu.memory_space<vmem>>, %arg6: memref<32x256xf32, #tpu.memory_space<vmem>>, %arg7: memref<1x256xf32, #tpu.memory_space<vmem>>, %arg8: memref<1x128xf32, #tpu.memory_space<vmem>>, %arg9: memref<1x128xf32, #tpu.memory_space<vmem>>, %arg10: memref<128x16xf32, #tpu.memory_space<vmem>>, %arg11: memref<16x256xf32, #tpu.memory_space<vmem>>, %arg12: memref<1x256xf32, #tpu.memory_space<vmem>>, %arg13: memref<128x128xf32, #tpu.memory_space<vmem>>, %arg14: memref<1x128xf32, #tpu.memory_space<vmem>>, %arg15: memref<8x256xf32, #tpu.memory_space<vmem>>, %arg16: memref<8x128xf32, #tpu.memory_space<vmem>>, %arg17: memref<1x8xf32, #tpu.memory_space<vmem>>, %arg18: memref<1x8xf32, #tpu.memory_space<vmem>>, %arg19: memref<8x32xf32, #tpu.memory_space<vmem>>) attributes {dimension_semantics = [#tpu.dimension_semantics<arbitrary>], iteration_bounds = array<i64: 1>, scalar_prefetch = 0 : i64, scratch_operands = 3 : i64, tpu.core_type = #tpu.core_type<tc>, window_params = [{transform_indices = @transform_0, window_bounds = array<i64: 16, 32>}, {transform_indices = @transform_1, window_bounds = array<i64: 16, 1>}, {transform_indices = @transform_2, window_bounds = array<i64: 16, 1>}, {pipeline_mode = #tpu.pipeline_mode<synchronous>, transform_indices = @transform_3, window_bounds = array<i64: 1, 32>}, {pipeline_mode = #tpu.pipeline_mode<synchronous>, transform_indices = @transform_4, window_bounds = array<i64: 1, 1>}, {pipeline_mode = #tpu.pipeline_mode<synchronous>, transform_indices = @transform_5, window_bounds = array<i64: 32, 256>}, {pipeline_mode = #tpu.pipeline_mode<synchronous>, transform_indices = @transform_6, window_bounds = array<i64: 1, 256>}, {pipeline_mode = #tpu.pipeline_mode<synchronous>, transform_indices = @transform_7, window_bounds = array<i64: 1, 128>}, {pipeline_mode = #tpu.pipeline_mode<synchronous>, transform_indices = @transform_8, window_bounds = array<i64: 1, 128>}, {pipeline_mode = #tpu.pipeline_mode<synchronous>, transform_indices = @transform_9, window_bounds = array<i64: 128, 16>}, {pipeline_mode = #tpu.pipeline_mode<synchronous>, transform_indices = @transform_10, window_bounds = array<i64: 16, 256>}, {pipeline_mode = #tpu.pipeline_mode<synchronous>, transform_indices = @transform_11, window_bounds = array<i64: 1, 256>}, {pipeline_mode = #tpu.pipeline_mode<synchronous>, transform_indices = @transform_12, window_bounds = array<i64: 128, 128>}, {pipeline_mode = #tpu.pipeline_mode<synchronous>, transform_indices = @transform_13, window_bounds = array<i64: 1, 128>}, {pipeline_mode = #tpu.pipeline_mode<synchronous>, transform_indices = @transform_14, window_bounds = array<i64: 8, 256>}, {pipeline_mode = #tpu.pipeline_mode<synchronous>, transform_indices = @transform_15, window_bounds = array<i64: 8, 128>}]} {
    %c0_i32 = arith.constant 0 : i32
    %0 = arith.cmpi eq, %arg0, %c0_i32 : i32
    %1 = arith.extui %0 : i1 to i32
    %c0_i32_0 = arith.constant 0 : i32
    %2 = arith.cmpi ne, %1, %c0_i32_0 : i32
    scf.if %2 {
      %cst_31 = arith.constant -3.000000e+38 : f32
      %70 = vector.broadcast %cst_31 : f32 to vector<1x8xf32>
      %c0_32 = arith.constant 0 : index
      %c0_33 = arith.constant 0 : index
      %71 = vector.load %arg17[%c0_32, %c0_33] : memref<1x8xf32, #tpu.memory_space<vmem>>, vector<1x8xf32>
      tpu.vector_store %arg17[%c0_32, %c0_33], %70 {strides = array<i32>} : memref<1x8xf32, #tpu.memory_space<vmem>>, vector<1x8xf32>,
      %cst_34 = arith.constant 0.000000e+00 : f32
      %72 = vector.broadcast %cst_34 : f32 to vector<1x8xf32>
      %c0_35 = arith.constant 0 : index
      %c0_36 = arith.constant 0 : index
      %73 = vector.load %arg18[%c0_35, %c0_36] : memref<1x8xf32, #tpu.memory_space<vmem>>, vector<1x8xf32>
      tpu.vector_store %arg18[%c0_35, %c0_36], %72 {strides = array<i32>} : memref<1x8xf32, #tpu.memory_space<vmem>>, vector<1x8xf32>,
      %cst_37 = arith.constant 0.000000e+00 : f32
      %74 = vector.broadcast %cst_37 : f32 to vector<8x32xf32>
      %c0_38 = arith.constant 0 : index
      %c0_39 = arith.constant 0 : index
      %75 = vector.load %arg19[%c0_38, %c0_39] : memref<8x32xf32, #tpu.memory_space<vmem>>, vector<8x32xf32>
      tpu.vector_store %arg19[%c0_38, %c0_39], %74 {strides = array<i32>} : memref<8x32xf32, #tpu.memory_space<vmem>>, vector<8x32xf32>,
    } else {
    }
    %c0 = arith.constant 0 : index
    %c0_1 = arith.constant 0 : index
    %3 = vector.load %arg1[%c0, %c0_1] : memref<16x32xbf16, #tpu.memory_space<vmem>>, vector<16x32xbf16>
    %4 = arith.extf %3 : vector<16x32xbf16> to vector<16x32xf32>
    %c0_2 = arith.constant 0 : index
    %c0_3 = arith.constant 0 : index
    %5 = vector.load %arg2[%c0_2, %c0_3] : memref<16x1xi32, #tpu.memory_space<vmem>>, vector<16x1xi32>
    %c0_4 = arith.constant 0 : index
    %c0_5 = arith.constant 0 : index
    %6 = vector.load %arg4[%c0_4, %c0_5] : memref<1x32xf32, #tpu.memory_space<vmem>>, vector<1x32xf32>
    %7 = vector.broadcast %6 : vector<1x32xf32> to vector<16x32xf32>
    %8 = arith.mulf %4, %7 : vector<16x32xf32>
    %cst = arith.constant dense<0.000000e+00> : vector<16xf32>
    %9 = vector.multi_reduction <add>, %8, %cst [1] : vector<16x32xf32> to vector<16xf32>
    %10 = vector.shape_cast %9 : vector<16xf32> to vector<16x1xf32>
    %c0_6 = arith.constant 0 : index
    %c0_7 = arith.constant 0 : index
    %11 = vector.load %arg5[%c0_6, %c0_7] : memref<1x1xf32, #tpu.memory_space<vmem>>, vector<1x1xf32>
    %12 = vector.broadcast %11 : vector<1x1xf32> to vector<16x1xf32>
    %13 = arith.addf %10, %12 : vector<16x1xf32>
    %14 = tpu.iota {dimensions = array<i32: 1>} : vector<16x8xi32>
    %15 = vector.broadcast %5 : vector<16x1xi32> to vector<16x8xi32>
    %16 = arith.cmpi eq, %14, %15 : vector<16x8xi32>
    %cst_8 = arith.constant -3.000000e+38 : f32
    %17 = vector.shape_cast %13 : vector<16x1xf32> to vector<16x1xf32>
    %18 = vector.broadcast %17 : vector<16x1xf32> to vector<16x8xf32>
    %19 = vector.broadcast %cst_8 : f32 to vector<16x8xf32>
    %20 = arith.select %16, %18, %19 : vector<16x8xi1>, vector<16x8xf32>
    %cst_9 = arith.constant dense<0xFF800000> : vector<8xf32>
    %21 = vector.multi_reduction <maximumf>, %20, %cst_9 [0] : vector<16x8xf32> to vector<8xf32>
    %22 = vector.shape_cast %21 : vector<8xf32> to vector<1x8xf32>
    %c0_10 = arith.constant 0 : index
    %c0_11 = arith.constant 0 : index
    %23 = vector.load %arg17[%c0_10, %c0_11] : memref<1x8xf32, #tpu.memory_space<vmem>>, vector<1x8xf32>
    %24 = arith.maximumf %23, %22 : vector<1x8xf32>
    %25 = arith.subf %23, %24 : vector<1x8xf32>
    %26 = math.exp %25 : vector<1x8xf32>
    %cst_12 = arith.constant 0.000000e+00 : f32
    %27 = vector.shape_cast %24 : vector<1x8xf32> to vector<1x8xf32>
    %28 = vector.broadcast %27 : vector<1x8xf32> to vector<16x8xf32>
    %29 = vector.broadcast %cst_12 : f32 to vector<16x8xf32>
    %30 = arith.select %16, %28, %29 : vector<16x8xi1>, vector<16x8xf32>
    %cst_13 = arith.constant dense<0.000000e+00> : vector<16xf32>
    %31 = vector.multi_reduction <add>, %30, %cst_13 [1] : vector<16x8xf32> to vector<16xf32>
    %32 = vector.shape_cast %31 : vector<16xf32> to vector<16x1xf32>
    %33 = arith.subf %13, %32 : vector<16x1xf32>
    %34 = math.exp %33 : vector<16x1xf32>
    %cst_14 = arith.constant 0.000000e+00 : f32
    %35 = vector.shape_cast %34 : vector<16x1xf32> to vector<16x1xf32>
    %36 = vector.broadcast %35 : vector<16x1xf32> to vector<16x8xf32>
    %37 = vector.broadcast %cst_14 : f32 to vector<16x8xf32>
    %38 = arith.select %16, %36, %37 : vector<16x8xi1>, vector<16x8xf32>
    %cst_15 = arith.constant dense<0.000000e+00> : vector<8xf32>
    %39 = vector.multi_reduction <add>, %38, %cst_15 [0] : vector<16x8xf32> to vector<8xf32>
    %40 = vector.shape_cast %39 : vector<8xf32> to vector<1x8xf32>
    %c0_16 = arith.constant 0 : index
    %c0_17 = arith.constant 0 : index
    %41 = vector.load %arg18[%c0_16, %c0_17] : memref<1x8xf32, #tpu.memory_space<vmem>>, vector<1x8xf32>
    %42 = arith.mulf %26, %41 : vector<1x8xf32>
    %43 = arith.addf %42, %40 : vector<1x8xf32>
    %c0_18 = arith.constant 0 : index
    %c0_19 = arith.constant 0 : index
    %44 = vector.load %arg18[%c0_18, %c0_19] : memref<1x8xf32, #tpu.memory_space<vmem>>, vector<1x8xf32>
    tpu.vector_store %arg18[%c0_18, %c0_19], %43 {strides = array<i32>} : memref<1x8xf32, #tpu.memory_space<vmem>>, vector<1x8xf32>,
    %c0_20 = arith.constant 0 : index
    %c0_21 = arith.constant 0 : index
    %45 = vector.load %arg17[%c0_20, %c0_21] : memref<1x8xf32, #tpu.memory_space<vmem>>, vector<1x8xf32>
    tpu.vector_store %arg17[%c0_20, %c0_21], %24 {strides = array<i32>} : memref<1x8xf32, #tpu.memory_space<vmem>>, vector<1x8xf32>,
    %46 = arith.extui %16 : vector<16x8xi1> to vector<16x8xi32>
    %47 = arith.sitofp %46 : vector<16x8xi32> to vector<16x8xf32>
    %48 = arith.truncf %47 : vector<16x8xf32> to vector<16x8xbf16>
    %49 = vector.broadcast %34 : vector<16x1xf32> to vector<16x32xf32>
    %50 = arith.mulf %49, %4 : vector<16x32xf32>
    %51 = arith.truncf %50 : vector<16x32xf32> to vector<16x32xbf16>
    %cst_22 = arith.constant dense<0.000000e+00> : vector<8x32xf32>
    %52 = tpu.matmul %48, %51, %cst_22 {dimension_numbers = #tpu.dot_dimension_numbers<[0], [0], [1], [1], [0, 1, 1, 1], [], []>} : vector<16x8xbf16>, vector<16x32xbf16>, vector<8x32xf32> -> vector<8x32xf32>
    %c0_23 = arith.constant 0 : index
    %c0_24 = arith.constant 0 : index
    %53 = vector.load %arg19[%c0_23, %c0_24] : memref<8x32xf32, #tpu.memory_space<vmem>>, vector<8x32xf32>
    %54 = tpu.iota {dimensions = array<i32: 0>} : vector<8x8xi32>
    %55 = tpu.iota {dimensions = array<i32: 1>} : vector<8x8xi32>
    %56 = arith.cmpi eq, %54, %55 : vector<8x8xi32>
    %cst_25 = arith.constant 0.000000e+00 : f32
    %57 = vector.shape_cast %26 : vector<1x8xf32> to vector<1x8xf32>
    %58 = vector.broadcast %57 : vector<1x8xf32> to vector<8x8xf32>
    %59 = vector.broadcast %cst_25 : f32 to vector<8x8xf32>
    %60 = arith.select %56, %58, %59 : vector<8x8xi1>, vector<8x8xf32>
    %cst_26 = arith.constant dense<0.000000e+00> : vector<8xf32>
    %61 = vector.multi_reduction <add>, %60, %cst_26 [1] : vector<8x8xf32> to vector<8xf32>
    %62 = vector.shape_cast %61 : vector<8xf32> to vector<8x1xf32>
    %63 = vector.broadcast %62 : vector<8x1xf32> to vector<8x32xf32>
    %64 = arith.mulf %53, %63 : vector<8x32xf32>
    %65 = arith.addf %64, %52 : vector<8x32xf32>
    %c0_27 = arith.constant 0 : index
    %c0_28 = arith.constant 0 : index
    %66 = vector.load %arg19[%c0_27, %c0_28] : memref<8x32xf32, #tpu.memory_space<vmem>>, vector<8x32xf32>
    tpu.vector_store %arg19[%c0_27, %c0_28], %65 {strides = array<i32>} : memref<8x32xf32, #tpu.memory_space<vmem>>, vector<8x32xf32>,
    %c0_i32_29 = arith.constant 0 : i32
    %67 = arith.cmpi eq, %arg0, %c0_i32_29 : i32
    %68 = arith.extui %67 : i1 to i32
    %c0_i32_30 = arith.constant 0 : i32
    %69 = arith.cmpi ne, %68, %c0_i32_30 : i32
    scf.if %69 {
      %c0_31 = arith.constant 0 : index
      %c0_32 = arith.constant 0 : index
      %70 = vector.load %arg18[%c0_31, %c0_32] : memref<1x8xf32, #tpu.memory_space<vmem>>, vector<1x8xf32>
      %cst_33 = arith.constant 0.000000e+00 : f32
      %71 = vector.broadcast %cst_33 : f32 to vector<1x8xf32>
      %72 = arith.cmpf ogt, %70, %71 : vector<1x8xf32>
      %cst_34 = arith.constant 1.000000e+00 : f32
      %73 = vector.broadcast %cst_34 : f32 to vector<1x8xf32>
      %74 = arith.select %72, %70, %73 : vector<1x8xi1>, vector<1x8xf32>
      %c0_35 = arith.constant 0 : index
      %c0_36 = arith.constant 0 : index
      %75 = vector.load %arg19[%c0_35, %c0_36] : memref<8x32xf32, #tpu.memory_space<vmem>>, vector<8x32xf32>
      %76 = tpu.reciprocal %74 : vector<1x8xf32> -> vector<1x8xf32>
      %77 = tpu.iota {dimensions = array<i32: 0>} : vector<8x8xi32>
      %78 = tpu.iota {dimensions = array<i32: 1>} : vector<8x8xi32>
      %79 = arith.cmpi eq, %77, %78 : vector<8x8xi32>
      %cst_37 = arith.constant 0.000000e+00 : f32
      %80 = vector.shape_cast %76 : vector<1x8xf32> to vector<1x8xf32>
      %81 = vector.broadcast %80 : vector<1x8xf32> to vector<8x8xf32>
      %82 = vector.broadcast %cst_37 : f32 to vector<8x8xf32>
      %83 = arith.select %79, %81, %82 : vector<8x8xi1>, vector<8x8xf32>
      %cst_38 = arith.constant dense<0.000000e+00> : vector<8xf32>
      %84 = vector.multi_reduction <add>, %83, %cst_38 [1] : vector<8x8xf32> to vector<8xf32>
      %85 = vector.shape_cast %84 : vector<8xf32> to vector<8x1xf32>
      %86 = vector.broadcast %85 : vector<8x1xf32> to vector<8x32xf32>
      %87 = arith.mulf %75, %86 : vector<8x32xf32>
      %c0_39 = arith.constant 0 : index
      %c0_40 = arith.constant 0 : index
      %88 = vector.load %arg6[%c0_39, %c0_40] : memref<32x256xf32, #tpu.memory_space<vmem>>, vector<32x256xf32>
      %cst_41 = arith.constant dense<0.000000e+00> : vector<8x256xf32>
      %89 = tpu.matmul %87, %88, %cst_41 {dimension_numbers = #tpu.dot_dimension_numbers<[1], [0], [0], [1], [0, 0, 1, 1], [], []>} : vector<8x32xf32>, vector<32x256xf32>, vector<8x256xf32> -> vector<8x256xf32>
      %c0_42 = arith.constant 0 : index
      %c0_43 = arith.constant 0 : index
      %90 = vector.load %arg7[%c0_42, %c0_43] : memref<1x256xf32, #tpu.memory_space<vmem>>, vector<1x256xf32>
      %91 = vector.broadcast %90 : vector<1x256xf32> to vector<8x256xf32>
      %92 = arith.addf %89, %91 : vector<8x256xf32>
      %93 = vector.extract_strided_slice %92 {offsets = [0, 0], sizes = [8, 128], strides = [1, 1]} : vector<8x256xf32> to vector<8x128xf32>
      %94 = vector.extract_strided_slice %92 {offsets = [0, 128], sizes = [8, 128], strides = [1, 1]} : vector<8x256xf32> to vector<8x128xf32>
      %cst_44 = arith.constant dense<0.000000e+00> : vector<8xf32>
      %95 = vector.multi_reduction <add>, %93, %cst_44 [1] : vector<8x128xf32> to vector<8xf32>
      %96 = vector.shape_cast %95 : vector<8xf32> to vector<8x1xf32>
      %cst_45 = arith.constant 3.125000e-02 : f32
      %97 = vector.broadcast %cst_45 : f32 to vector<8x1xf32>
      %98 = arith.mulf %96, %97 : vector<8x1xf32>
      %99 = arith.mulf %93, %93 : vector<8x128xf32>
      %cst_46 = arith.constant dense<0.000000e+00> : vector<8xf32>
      %100 = vector.multi_reduction <add>, %99, %cst_46 [1] : vector<8x128xf32> to vector<8xf32>
      %101 = vector.shape_cast %100 : vector<8xf32> to vector<8x1xf32>
      %cst_47 = arith.constant 3.125000e-02 : f32
      %102 = vector.broadcast %cst_47 : f32 to vector<8x1xf32>
      %103 = arith.mulf %101, %102 : vector<8x1xf32>
      %104 = arith.mulf %98, %98 : vector<8x1xf32>
      %105 = arith.subf %103, %104 : vector<8x1xf32>
      %106 = vector.broadcast %98 : vector<8x1xf32> to vector<8x128xf32>
      %107 = arith.subf %93, %106 : vector<8x128xf32>
      %cst_48 = arith.constant 9.99999974E-6 : f32
      %108 = vector.broadcast %cst_48 : f32 to vector<8x1xf32>
      %109 = arith.addf %105, %108 : vector<8x1xf32>
      %110 = math.rsqrt %109 : vector<8x1xf32>
      %111 = vector.broadcast %110 : vector<8x1xf32> to vector<8x128xf32>
      %112 = arith.mulf %107, %111 : vector<8x128xf32>
      %c0_49 = arith.constant 0 : index
      %c0_50 = arith.constant 0 : index
      %113 = vector.load %arg8[%c0_49, %c0_50] : memref<1x128xf32, #tpu.memory_space<vmem>>, vector<1x128xf32>
      %114 = vector.broadcast %113 : vector<1x128xf32> to vector<8x128xf32>
      %115 = arith.mulf %112, %114 : vector<8x128xf32>
      %c0_51 = arith.constant 0 : index
      %c0_52 = arith.constant 0 : index
      %116 = vector.load %arg9[%c0_51, %c0_52] : memref<1x128xf32, #tpu.memory_space<vmem>>, vector<1x128xf32>
      %117 = vector.broadcast %116 : vector<1x128xf32> to vector<8x128xf32>
      %118 = arith.addf %115, %117 : vector<8x128xf32>
      %cst_53 = arith.constant 0.000000e+00 : f32
      %119 = vector.broadcast %cst_53 : f32 to vector<8x128xf32>
      %120 = arith.maximumf %118, %119 : vector<8x128xf32>
      %c0_54 = arith.constant 0 : index
      %c0_55 = arith.constant 0 : index
      %121 = vector.load %arg10[%c0_54, %c0_55] : memref<128x16xf32, #tpu.memory_space<vmem>>, vector<128x16xf32>
      %cst_56 = arith.constant dense<0.000000e+00> : vector<8x16xf32>
      %122 = tpu.matmul %120, %121, %cst_56 {dimension_numbers = #tpu.dot_dimension_numbers<[1], [0], [0], [1], [0, 0, 1, 1], [], []>} : vector<8x128xf32>, vector<128x16xf32>, vector<8x16xf32> -> vector<8x16xf32>
      %cst_57 = arith.constant 0.000000e+00 : f32
      %123 = vector.broadcast %cst_57 : f32 to vector<8x16xf32>
      %124 = arith.maximumf %122, %123 : vector<8x16xf32>
      %c0_58 = arith.constant 0 : index
      %c0_59 = arith.constant 0 : index
      %125 = vector.load %arg11[%c0_58, %c0_59] : memref<16x256xf32, #tpu.memory_space<vmem>>, vector<16x256xf32>
      %cst_60 = arith.constant dense<0.000000e+00> : vector<8x256xf32>
      %126 = tpu.matmul %124, %125, %cst_60 {dimension_numbers = #tpu.dot_dimension_numbers<[1], [0], [0], [1], [0, 0, 1, 1], [], []>} : vector<8x16xf32>, vector<16x256xf32>, vector<8x256xf32> -> vector<8x256xf32>
      %c0_61 = arith.constant 0 : index
      %c0_62 = arith.constant 0 : index
      %127 = vector.load %arg12[%c0_61, %c0_62] : memref<1x256xf32, #tpu.memory_space<vmem>>, vector<1x256xf32>
      %128 = vector.broadcast %127 : vector<1x256xf32> to vector<8x256xf32>
      %129 = arith.addf %126, %128 : vector<8x256xf32>
      %130 = arith.negf %129 : vector<8x256xf32>
      %131 = math.exp %130 : vector<8x256xf32>
      %cst_63 = arith.constant 1.000000e+00 : f32
      %132 = vector.broadcast %cst_63 : f32 to vector<8x256xf32>
      %133 = arith.addf %132, %131 : vector<8x256xf32>
      %134 = arith.divf %132, %133 : vector<8x256xf32>
      %c0_64 = arith.constant 0 : index
      %c0_65 = arith.constant 0 : index
      %135 = vector.load %arg15[%c0_64, %c0_65] : memref<8x256xf32, #tpu.memory_space<vmem>>, vector<8x256xf32>
      tpu.vector_store %arg15[%c0_64, %c0_65], %134 {strides = array<i32>} : memref<8x256xf32, #tpu.memory_space<vmem>>, vector<8x256xf32>,
      %cst_66 = arith.constant 0.000000e+00 : f32
      %136 = vector.broadcast %cst_66 : f32 to vector<8x128xf32>
      %137 = arith.maximumf %94, %136 : vector<8x128xf32>
      %c0_67 = arith.constant 0 : index
      %c0_68 = arith.constant 0 : index
      %138 = vector.load %arg13[%c0_67, %c0_68] : memref<128x128xf32, #tpu.memory_space<vmem>>, vector<128x128xf32>
      %cst_69 = arith.constant dense<0.000000e+00> : vector<8x128xf32>
      %139 = tpu.matmul %137, %138, %cst_69 {dimension_numbers = #tpu.dot_dimension_numbers<[1], [0], [0], [1], [0, 0, 1, 1], [], []>} : vector<8x128xf32>, vector<128x128xf32>, vector<8x128xf32> -> vector<8x128xf32>
      %c0_70 = arith.constant 0 : index
      %c0_71 = arith.constant 0 : index
      %140 = vector.load %arg14[%c0_70, %c0_71] : memref<1x128xf32, #tpu.memory_space<vmem>>, vector<1x128xf32>
      %141 = vector.broadcast %140 : vector<1x128xf32> to vector<8x128xf32>
      %142 = arith.addf %139, %141 : vector<8x128xf32>
      %143 = arith.negf %142 : vector<8x128xf32>
      %144 = math.exp %143 : vector<8x128xf32>
      %cst_72 = arith.constant 1.000000e+00 : f32
      %145 = vector.broadcast %cst_72 : f32 to vector<8x128xf32>
      %146 = arith.addf %145, %144 : vector<8x128xf32>
      %147 = arith.divf %145, %146 : vector<8x128xf32>
      %c0_73 = arith.constant 0 : index
      %c0_74 = arith.constant 0 : index
      %148 = vector.load %arg16[%c0_73, %c0_74] : memref<8x128xf32, #tpu.memory_space<vmem>>, vector<8x128xf32>
      tpu.vector_store %arg16[%c0_73, %c0_74], %147 {strides = array<i32>} : memref<8x128xf32, #tpu.memory_space<vmem>>, vector<8x128xf32>,
    } else {
    }
    return
  }
  func.func @transform_0(%arg0: i32) -> (i32, i32) {
    %c0_i32 = arith.constant 0 : i32
    %c0_i32_0 = arith.constant 0 : i32
    return %arg0, %c0_i32 : i32, i32
  }
  func.func @transform_1(%arg0: i32) -> (i32, i32) {
    %c0_i32 = arith.constant 0 : i32
    %c0_i32_0 = arith.constant 0 : i32
    return %arg0, %c0_i32 : i32, i32
  }
  func.func @transform_2(%arg0: i32) -> (i32, i32) {
    %c0_i32 = arith.constant 0 : i32
    %c0_i32_0 = arith.constant 0 : i32
    return %arg0, %c0_i32 : i32, i32
  }
  func.func @transform_3(%arg0: i32) -> (i32, i32) {
    %c0_i32 = arith.constant 0 : i32
    %c0_i32_0 = arith.constant 0 : i32
    %c0_i32_1 = arith.constant 0 : i32
    return %c0_i32, %c0_i32_0 : i32, i32
  }
  func.func @transform_4(%arg0: i32) -> (i32, i32) {
    %c0_i32 = arith.constant 0 : i32
    %c0_i32_0 = arith.constant 0 : i32
    %c0_i32_1 = arith.constant 0 : i32
    return %c0_i32, %c0_i32_0 : i32, i32
  }
  func.func @transform_5(%arg0: i32) -> (i32, i32) {
    %c0_i32 = arith.constant 0 : i32
    %c0_i32_0 = arith.constant 0 : i32
    %c0_i32_1 = arith.constant 0 : i32
    return %c0_i32, %c0_i32_0 : i32, i32
  }
  func.func @transform_6(%arg0: i32) -> (i32, i32) {
    %c0_i32 = arith.constant 0 : i32
    %c0_i32_0 = arith.constant 0 : i32
    %c0_i32_1 = arith.constant 0 : i32
    return %c0_i32, %c0_i32_0 : i32, i32
  }
  func.func @transform_7(%arg0: i32) -> (i32, i32) {
    %c0_i32 = arith.constant 0 : i32
    %c0_i32_0 = arith.constant 0 : i32
    %c0_i32_1 = arith.constant 0 : i32
    return %c0_i32, %c0_i32_0 : i32, i32
  }
  func.func @transform_8(%arg0: i32) -> (i32, i32) {
    %c0_i32 = arith.constant 0 : i32
    %c0_i32_0 = arith.constant 0 : i32
    %c0_i32_1 = arith.constant 0 : i32
    return %c0_i32, %c0_i32_0 : i32, i32
  }
  func.func @transform_9(%arg0: i32) -> (i32, i32) {
    %c0_i32 = arith.constant 0 : i32
    %c0_i32_0 = arith.constant 0 : i32
    %c0_i32_1 = arith.constant 0 : i32
    return %c0_i32, %c0_i32_0 : i32, i32
  }
  func.func @transform_10(%arg0: i32) -> (i32, i32) {
    %c0_i32 = arith.constant 0 : i32
    %c0_i32_0 = arith.constant 0 : i32
    %c0_i32_1 = arith.constant 0 : i32
    return %c0_i32, %c0_i32_0 : i32, i32
  }
  func.func @transform_11(%arg0: i32) -> (i32, i32) {
    %c0_i32 = arith.constant 0 : i32
    %c0_i32_0 = arith.constant 0 : i32
    %c0_i32_1 = arith.constant 0 : i32
    return %c0_i32, %c0_i32_0 : i32, i32
  }
  func.func @transform_12(%arg0: i32) -> (i32, i32) {
    %c0_i32 = arith.constant 0 : i32
    %c0_i32_0 = arith.constant 0 : i32
    %c0_i32_1 = arith.constant 0 : i32
    return %c0_i32, %c0_i32_0 : i32, i32
  }
  func.func @transform_13(%arg0: i32) -> (i32, i32) {
    %c0_i32 = arith.constant 0 : i32
    %c0_i32_0 = arith.constant 0 : i32
    %c0_i32_1 = arith.constant 0 : i32
    return %c0_i32, %c0_i32_0 : i32, i32
  }
  func.func @transform_14(%arg0: i32) -> (i32, i32) {
    %c0_i32 = arith.constant 0 : i32
    %c0_i32_0 = arith.constant 0 : i32
    %c0_i32_1 = arith.constant 0 : i32
    return %c0_i32, %c0_i32_0 : i32, i32
  }
  func.func @transform_15(%arg0: i32) -> (i32, i32) {
    %c0_i32 = arith.constant 0 : i32
    %c0_i32_0 = arith.constant 0 : i32
    %c0_i32_1 = arith.constant 0 : i32
    return %c0_i32, %c0_i32_0 : i32, i32
  }
}

</mosaic_0001>

<bundles_post_ra>
// kernel: tpu_custom_call.1
= control target key start
LH: loop header
LB: loop body
LE: loop exit
PB: predicated region body
PF: predicated region fallthrough
CT: control target
= control target key end

     0   :  { %s1415_s0 = inlined_call_operand.vmem [shape: bf16[16,32], index: 0, kind: input, shape index: {}]   ;;  %s1416_s1 = inlined_call_operand.vmem [shape: s32[16,1], index: 1, kind: input, shape index: {}]   ;;  %s1417_s2 = inlined_call_operand.vmem [shape: f32[16,1], index: 2, kind: input, shape index: {}]   ;;  %s1418_s3 = inlined_call_operand.vmem [shape: f32[1,32], index: 3, kind: input, shape index: {}]   ;;  %s1419_s4 = inlined_call_operand.<no memory space> [shape: f32[1,1], index: 4, kind: input, shape index: {}]   ;;  %s1420_s5 = inlined_call_operand.vmem [shape: f32[32,256], index: 5, kind: input, shape index: {}]   ;;  %s1421_s6 = inlined_call_operand.vmem [shape: f32[1,256], index: 6, kind: input, shape index: {}]   ;;  %s1422_s7 = inlined_call_operand.vmem [shape: f32[1,128], index: 7, kind: input, shape index: {}]   ;;  %s1423_s8 = inlined_call_operand.vmem [shape: f32[1,128], index: 8, kind: input, shape index: {}]   ;;  %s1424_s9 = inlined_call_operand.vmem [shape: f32[128,16], index: 9, kind: input, shape index: {}]   ;;  %s1425_s10 = inlined_call_operand.hbm [shape: f32[16,256], index: 10, kind: input, shape index: {}]   ;;  %s1426_s11 = inlined_call_operand.vmem [shape: f32[1,256], index: 11, kind: input, shape index: {}]   ;;  %s1427_s12 = inlined_call_operand.vmem [shape: f32[128,128], index: 12, kind: input, shape index: {}]   ;;  %s1428_s13 = inlined_call_operand.vmem [shape: f32[1,128], index: 13, kind: input, shape index: {}]   ;;  %s1429_s14 = inlined_call_operand.hbm [shape: f32[8,256], index: 14, kind: output, shape index: {0}]   ;;  %s1430_s15 = inlined_call_operand.hbm [shape: f32[8,128], index: 15, kind: output, shape index: {1}]  }
   0x1   :  { %v21_v0 = vstv %s1419_s4 }
   0x2   :  { %22 = vst [vmem:[#allocation5] sm:$0x1] %v21_v0 }
   0x3   :  { %23 = vsyncpa [#allocation7], 0 }
   0x4   :  { %24 = vsyncpa [#allocation8], 0 }
   0x5   :  { %25 = vsyncpa [#allocation11], 0  ;;  %s1036_s19 = smov [#allocation6]   ;;  %s964_s22 = scalar_lea.hbm %s1425_s10, 512 }
   0x6   :  { %s51_s2 = sshll.u32 %s1036_s19, 4  ;;  %p965_p0 = scmp.ne.s32.totalorder %s1425_s10, %s964_s22  ;;  %s52_s2 = int_to_ptr.vmem [resolvable:$true] %s51_s2 }
   0x7   :  { %p968_p1 = scmp.lt.u32.totalorder %s964_s22, %s1425_s10 }
   0x9   :  { %p970_p2 = pnand %p968_p1, %p965_p0 }
   0xb   :  { %973 = shalt.err (!%p970_p2)
}
   0xc   :  { %s974_s4 = scalar_lea.vmem %s52_s2, 512  ;;  %p979_p4 = scmp.lt.s32.totalorder %s52_s2, %s52_s2 }
   0xd   :  { %p975_p3 = scmp.ne.s32.totalorder %s52_s2, %s974_s4  ;;  %p980_p5 = scmp.lt.s32.totalorder %s974_s4, %s974_s4 }
   0xf   :  { %p981_p6 = por %p980_p5, %p979_p4 }
  0x11   :  { %p982_p7 = pnand %p981_p6, %p975_p3 }
  0x13   :  { %985 = shalt.err (!%p982_p7)
}
  0x14   :  { %s1037_s27 = smov 256   ;;  %s1038_s28 = smov 16  }
  0x15   :  { %57 = dma.hbm_to_vmem [thread:$0]  %s1425_s10, 512, %s52_s2, [#allocation7], %s1037_s27, %s1037_s27, %s1038_s28  }
  0x16   :  { %1030 = dma.done.wait [#allocation7], 512  }
  0x17   :  { %1031 = vsyncadd [#allocation7], 4294966784  ;;  %vm75_vm0 = vcmask 261120   ;;  %v1039_v1 = vmov 0.0   ;;  %v1040_v2 = vmov 0   ;;  %v1148_v3 = vld [vmem:[%s1415_s0] sm:$0xff]   ;;  %v108_v19 = vlaneseq }
  0x18   :  { %76 = vst.msk [vmem:[#allocation4] sm:$0xff] %vm75_vm0, %v1039_v1  ;;  %940 = vset.pattern.permute.xlu1 %v1040_v2  ;;  %941 = vset.pattern.permute.xlu0 %v1040_v2  ;;  %v741_v4 = vld [vmem:[%s1418_s3] ss:$0 sm:$0xff]  ;;  %v756_v6 = vunpack.c.l.bf16 %v1148_v3  ;;  %v757_v7 = vunpack.c.h.bf16 %v1148_v3  ;;  %v82_v8 = vld [vmem:[%s1416_s1 + $0x8] sm:$0xff]  ;;  %vm72_vm1 = vcmask 57344   ;;  %vm130_vm3 = vcmask 64512  }
  0x19   :  { %794 = vmatprep.subr.bf16.mxu0 %v1039_v1  ;;  %383 = vmatprep.mubr.f32.mxu1 %v1039_v1  ;;  %v81_v5 = vld [vmem:[%s1416_s1] sm:$0xff]  ;;  %v742_v13 = vld [vmem:[#allocation5] ss:$0 sm:$0xff]  ;;  %v1041_v18 = vmov -3e+38   ;;  %v1170_v21 = vand.u32 127, %v108_v19 }
  0x1a   :  { %111 = vperm.xlu1 %940, %v81_v5   ;;  %v90_v9 = vmul.f32 %v756_v6, %v741_v4  ;;  %v91_v10 = vmul.f32 %v757_v7, %v741_v4  ;;  %73 = vst.msk [vmem:[#allocation2] sm:$0x1] %vm72_vm1, %v1041_v18  ;;  %74 = vst.msk [vmem:[#allocation3] sm:$0x1] %vm72_vm1, %v1039_v1  ;;  %v1180_v33 = vshrl.u32 %v108_v19, 7  ;;  %vm1042_vm5 = vmmov 0  }
  0x1b   :  { %796 = vmatprep.mubr.msk.bf16.mxu0 %vm1042_vm5, %v1039_v1  ;;  %vm216_vm7 = vcmask 130048  }
  0x1c   :  { %v93_v11 = vsel %vm75_vm0, %v90_v9, 0.0  ;;  %v96_v12 = vsel %vm75_vm0, %v91_v10, 0.0  ;;  %v1183_v37 = vsub.s32 0, %v1180_v33  ;;  %vm263_vm6 = vcmp.eq.s32.totalorder %v1180_v33, %v1170_v21 }
  0x1d   :  { %94 = vadd.xlane.f32.xlu0 %v93_v11 }
  0x1e   :  { %114 = vperm.xlu1 %940, %v82_v8  }
  0x21   :  { %97 = vadd.xlane.f32.xlu0 %v96_v12  ;;  %v140_v36 = vld [vmem:[#allocation2] sm:$0x1]  ;;  %v186_v3 = vld [vmem:[#allocation3] sm:$0x1] }
  0x99   :  { %v112_v20 = vpop.permute.xlu1 %111 }
  0x9a   :  { %vm116_vm2 = vcmp.eq.s32.totalorder %v1170_v21, %v112_v20 }
  0x9b   :  { %v743_v55 = vsel %vm116_vm2, 1.0, %v1039_v1 }
  0x9d   :  { %v115_v22 = vpop.permute.xlu1 %114 }
  0x9e   :  { %vm117_vm4 = vcmp.eq.s32.totalorder %v1170_v21, %v115_v22  ;;  %v298_v21 = vld [vmem:[%s1420_s5 + $0x10] sm:$0xff] }
  0x9f   :  { %v744_v56 = vsel %vm117_vm4, 1.0, %v1039_v1 }
  0xa0   :  { %v196_v57 = vpack.c.bf16 %v744_v56, %v743_v55  ;;  %v615_v55 = vld [vmem:[%s1427_s12 + $0x18] sm:$0xff] }
  0xaa   :  { %v95_v14 = vpop.xlane.xlu0 %94 }
  0xab   :  { %v106_v15 = vadd.f32 %v742_v13, %v95_v14 }
  0xad   :  { %120 = vperm.xlu0 %941, %v106_v15  }
  0xae   :  { %v98_v16 = vpop.xlane.xlu0 %97 }
  0xaf   :  { %v107_v17 = vadd.f32 %v742_v13, %v98_v16 }
  0xb1   :  { %125 = vperm.xlu1 %940, %v107_v17  }
 0x12c   :  { %v121_v23 = vpop.permute.xlu0 %120 }
 0x12d   :  { %v128_v24 = vsel %vm116_vm2, %v121_v23, -3e+38 }
 0x12e   :  { %v131_v27 = vsel %vm130_vm3, %v128_v24, -inf }
 0x130   :  { %v126_v25 = vpop.permute.xlu1 %125 }
 0x131   :  { %v129_v26 = vsel %vm117_vm4, %v126_v25, -3e+38 }
 0x132   :  { %v132_v28 = vsel %vm130_vm3, %v129_v26, -inf  ;;  %v297_v26 = vld [vmem:[%s1420_s5 + $0x8] sm:$0xff] }
 0x133   :  { %v133_v29 = vmax.f32 %v131_v27, %v132_v28  ;;  %v299_v27 = vld [vmem:[%s1420_s5 + $0x18] sm:$0xff] }
 0x134   :  { %v870_v28 = vpack.c.bf16 %v299_v27, %v297_v26  ;;  %v422_v26 = vld [vmem:[%s1424_s9 + $0x10] sm:$0xff]  ;;  %v423_v27 = vld [vmem:[%s1424_s9 + $0x18] sm:$0xff] }
 0x135   :  { %v134_v30 = vrot.slane %v133_v29, 4 }
 0x136   :  { %871 = vmatprep.subr.bf16.mxu1 %v870_v28  ;;  %v882_v28 = vpack.c.bf16 %v423_v27, %v422_v26 }
 0x137   :  { %v135_v31 = vmax.f32 %v133_v29, %v134_v30  ;;  %v296_v29 = vld [vmem:[%s1420_s5] sm:$0xff]  ;;  %v301_v30 = vld [vmem:[%s1420_s5 + $0x28] sm:$0xff] }
 0x139   :  { %v136_v32 = vrot.slane %v135_v31, 2 }
 0x13b   :  { %v137_v34 = vmax.f32 %v135_v31, %v136_v32  ;;  %v872_v31 = vpack.c.bf16 %v298_v21, %v296_v29  ;;  %v303_v32 = vld [vmem:[%s1420_s5 + $0x38] sm:$0xff]  ;;  %v424_v29 = vld [vmem:[%s1424_s9 + $0x20] sm:$0xff]  ;;  %v425_v21 = vld [vmem:[%s1424_s9 + $0x28] sm:$0xff] }
 0x13d   :  { %v138_v35 = vrot.slane %v137_v34, 1  ;;  %873 = vmatpush1.bf16.msra.mxu1 %v872_v31  ;;  %v426_v31 = vld [vmem:[%s1424_s9 + $0x30] sm:$0xff] }
 0x13f   :  { %v139_v38 = vmax.f32 %v137_v34, %v138_v35  ;;  %v300_v34 = vld [vmem:[%s1420_s5 + $0x20] sm:$0xff]  ;;  %v302_v35 = vld [vmem:[%s1420_s5 + $0x30] sm:$0xff] }
 0x141   :  { %v141_v39 = vmax.f32 %v140_v36, %v139_v38  ;;  %v876_v38 = vpack.c.bf16 %v302_v35, %v300_v34  ;;  %v428_v35 = vld [vmem:[%s1424_s9 + $0x40] sm:$0xff] }
 0x143   :  { %v149_v40 = vrot.slane %v141_v39, %v1183_v37  ;;  %191 = vst.msk [vmem:[#allocation2] sm:$0x1] %vm72_vm1, %v141_v39  ;;  %v142_v41 = vsub.f32 %v140_v36, %v141_v39  ;;  %v874_v36 = vpack.c.bf16 %v303_v32, %v301_v30  ;;  %v1043_v39 = vmov 0.0|0.0   ;;  %v427_v32 = vld [vmem:[%s1424_s9 + $0x38] sm:$0xff] }
 0x144   :  { %v885_v30 = vpack.c.bf16 %v425_v21, %v424_v29  ;;  %v888_v34 = vpack.c.bf16 %v427_v32, %v426_v31 }
 0x145   :  { %v151_v42 = vsel %vm116_vm2, %v149_v40, 0.0  ;;  %v152_v44 = vsel %vm117_vm4, %v149_v40, 0.0  ;;  %v143_v54 = vmul.f32 1.442695, %v142_v41  ;;  %875 = vmatprep.subr.bf16.mxu1 %v874_v36  ;;  %v260_v40 = vld [vmem:[#allocation4] sm:$0xff] }
 0x146   :  { %v153_v43 = vsel %vm130_vm3, %v151_v42, 0.0  ;;  %v156_v45 = vsel %vm130_vm3, %v152_v44, 0.0  ;;  %877 = vmatpush1.bf16.msra.mxu1 %v876_v38  ;;  %v429_v36 = vld [vmem:[%s1424_s9 + $0x48] sm:$0xff] }
 0x147   :  { %154 = vadd.xlane.f32.xlu1 %v153_v43  ;;  %906 = vmatprep.subr.bf16.mxu1 %v1043_v39  ;;  %v891_v38 = vpack.c.bf16 %v429_v36, %v428_v35 }
 0x14b   :  { %157 = vadd.xlane.f32.xlu1 %v156_v45 }
 0x1d4   :  { %v155_v46 = vpop.xlane.xlu1 %154 }
 0x1d5   :  { %v159_v47 = vsub.f32 %v106_v15, %v155_v46 }
 0x1d7   :  { %v161_v48 = vmul.f32 1.442695, %v159_v47 }
 0x1d8   :  { %v158_v49 = vpop.xlane.xlu1 %157 }
 0x1d9   :  { %942 = vpow2.f32 %v161_v48  ;;  %v160_v50 = vsub.f32 %v107_v17, %v158_v49  ;;  %v612_v48 = vld [vmem:[%s1427_s12] sm:$0xff]  ;;  %v613_v49 = vld [vmem:[%s1427_s12 + $0x8] sm:$0xff] }
 0x1db   :  { %v163_v51 = vmul.f32 1.442695, %v160_v50 }
 0x1dd   :  { %944 = vpow2.f32 %v163_v51 }
 0x1de   :  { %946 = vpow2.f32 %v143_v54  ;;  %v614_v54 = vld [vmem:[%s1427_s12 + $0x10] sm:$0xff] }
 0x1df   :  { %v910_v56 = vpack.c.bf16 %v615_v55, %v614_v54 }
 0x1e3   :  { %v943_v52 = vpop.eup %942 }
 0x1e4   :  { %167 = vperm.xlu0 %941, %v943_v52   ;;  %v907_v52 = vpack.c.bf16 %v613_v49, %v612_v48  ;;  %v508_v49 = vld [vmem:[#allocation6 + $0x8] sm:$0xff] }
 0x1e7   :  { %v945_v53 = vpop.eup %944 }
 0x1e8   :  { %172 = vperm.xlu1 %940, %v945_v53   ;;  %v947_v58 = vpop.eup %946 }
 0x1e9   :  { %v268_v59 = vrot.slane %v947_v58, %v1183_v37  ;;  %v187_v17 = vmul.f32 %v947_v58, %v186_v3  ;;  %v617_v58 = vld [vmem:[%s1427_s12 + $0x28] sm:$0xff] }
 0x1eb   :  { %v270_v60 = vsel %vm263_vm6, %v268_v59, 0.0 }
 0x1ec   :  { %v271_v61 = vsel %vm130_vm3, %v270_v60, 0.0  ;;  %v618_v60 = vld [vmem:[%s1427_s12 + $0x30] sm:$0xff] }
 0x202   :  { %200 = vxpose.xlu0.c.b16.start.end [1/1] (short) (narrow) %v196_v57, 16  ;;  %v616_v57 = vld [vmem:[%s1427_s12 + $0x20] sm:$0xff] }
 0x203   :  { %v913_v59 = vpack.c.bf16 %v617_v58, %v616_v57 }
 0x20c   :  { %272 = vadd.xlane.f32.xlu1 %v271_v61  ;;  %v619_v61 = vld [vmem:[%s1427_s12 + $0x38] sm:$0xff] }
 0x263   :  { %v168_v62 = vpop.permute.xlu0 %167 }
 0x264   :  { %v175_v63 = vsel %vm116_vm2, %v168_v62, 0.0  ;;  %v197_v2 = vmul.f32 %v756_v6, %v168_v62  ;;  %v916_v62 = vpack.c.bf16 %v619_v61, %v618_v60  ;;  %v747_v61 = vld [vmem:[%s1422_s7] ss:$0 sm:$0xff]  ;;  %s1044_s7 = smov [#allocation10]  }
 0x265   :  { %v177_v8 = vsel %vm130_vm3, %v175_v63, 0.0  ;;  %v620_v63 = vld [vmem:[%s1427_s12 + $0x40] sm:$0xff] }
 0x267   :  { %v173_v0 = vpop.permute.xlu1 %172 }
 0x268   :  { %v176_v4 = vsel %vm117_vm4, %v173_v0, 0.0  ;;  %v198_v5 = vmul.f32 %v757_v7, %v173_v0  ;;  %v208_v13 = vpop.trf.xlu0  ;;  %v621_v0 = vld [vmem:[%s1427_s12 + $0x48] sm:$0xff] }
 0x269   :  { %v178_v9 = vsel %vm130_vm3, %v176_v4, 0.0  ;;  %v622_v4 = vld [vmem:[%s1427_s12 + $0x50] sm:$0xff] }
 0x26a   :  { %v179_v10 = vadd.f32 %v178_v9, %v177_v8  ;;  %v199_v11 = vpack.c.bf16 %v198_v5, %v197_v2  ;;  %v919_v2 = vpack.c.bf16 %v621_v0, %v620_v63  ;;  %v623_v5 = vld [vmem:[%s1427_s12 + $0x58] sm:$0xff]  ;;  %v624_v9 = vld [vmem:[%s1427_s12 + $0x60] sm:$0xff]  ;;  %v507_v0 = vld [vmem:[#allocation6] sm:$0xff] }
 0x26b   :  { %v922_v8 = vpack.c.bf16 %v623_v5, %v622_v4 }
 0x26c   :  { %v180_v12 = vrot.slane %v179_v10, 4  ;;  %795 = vmatpush3.bf16.msra.mxu0 %v199_v11 }
 0x26d   :  { %878 = vmatprep.subr.bf16.mxu0 %v1043_v39 }
 0x26e   :  { %v181_v14 = vadd.f32 %v180_v12, %v179_v10  ;;  %v625_v10 = vld [vmem:[%s1427_s12 + $0x68] sm:$0xff]  ;;  %v626_v12 = vld [vmem:[%s1427_s12 + $0x70] sm:$0xff] }
 0x26f   :  { %797 = vmatmul.mubr.msk.bf16.vlgmr.msra.gmra.mrb[0].mxu0 %vm216_vm7, %v208_v13  ;;  %v925_v11 = vpack.c.bf16 %v625_v10, %v624_v9  ;;  %v627_v13 = vld [vmem:[%s1427_s12 + $0x78] sm:$0xff]  ;;  %v752_v9 = vld [vmem:[%s1428_s13] ss:$0 sm:$0xff] }
 0x270   :  { %v182_v6 = vrot.slane %v181_v14, 2  ;;  %832 = vmatprep.mubr.msk.f32.mxu0 %vm1042_vm5, %v1039_v1 }
 0x272   :  { %v183_v15 = vadd.f32 %v182_v6, %v181_v14  ;;  %v928_v14 = vpack.c.bf16 %v627_v13, %v626_v12  ;;  %v420_v6 = vld [vmem:[%s1424_s9] sm:$0xff] }
 0x274   :  { %v184_v7 = vrot.slane %v183_v15, 1 }
 0x276   :  { %v185_v16 = vadd.f32 %v184_v7, %v183_v15  ;;  %v421_v15 = vld [vmem:[%s1424_s9 + $0x8] sm:$0xff]  ;;  %v304_v7 = vld [vmem:[%s1421_s6] sm:$0x3] }
 0x277   :  { %v879_v3 = vpack.c.bf16 %v421_v15, %v420_v6 }
 0x278   :  { %v188_v18 = vadd.f32 %v187_v17, %v185_v16  ;;  %v312_v16 = vsub.s32 1, %v1180_v33  ;;  %v309_v17 = vrot.slane %v304_v7, %v1183_v37 }
 0x279   :  { %880 = vmatpush3.bf16.msra.mxu0 %v879_v3 }
 0x27a   :  { %190 = vst.msk [vmem:[#allocation3] sm:$0x1] %vm72_vm1, %v188_v18  ;;  %881 = vmatprep.subr.bf16.mxu0 %v1043_v39  ;;  %v313_v18 = vrot.slane %v304_v7, %v312_v16 }
 0x27d   :  { %883 = vmatpush3.bf16.msra.mxu0 %v882_v28 }
 0x27e   :  { %884 = vmatprep.subr.bf16.mxu0 %v1043_v39 }
 0x281   :  { %v280_v19 = vld [vmem:[#allocation3] sm:$0x1]  ;;  %886 = vmatpush3.bf16.msra.mxu0 %v885_v30 }
 0x282   :  { %vm281_vm8 = vcmp.gt.f32.partialorder %v280_v19, 0.0  ;;  %887 = vmatprep.subr.bf16.mxu0 %v1043_v39 }
 0x283   :  { %v282_v20 = vsel %vm281_vm8, %v280_v19, 1.0 }
 0x284   :  { %948 = vrcp.f32 %v282_v20 }
 0x285   :  { %889 = vmatpush3.bf16.msra.mxu0 %v888_v34 }
 0x286   :  { %890 = vmatprep.subr.bf16.mxu0 %v1043_v39 }
 0x289   :  { %892 = vmatpush3.bf16.msra.mxu0 %v891_v38 }
 0x28a   :  { %893 = vmatprep.subr.bf16.mxu0 %v1043_v39 }
 0x28e   :  { %v949_v22 = vpop.eup %948 }
 0x28f   :  { %v289_v23 = vrot.slane %v949_v22, %v1183_v37 }
 0x291   :  { %v291_v24 = vsel %vm263_vm6, %v289_v23, 0.0 }
 0x292   :  { %v292_v25 = vsel %vm130_vm3, %v291_v24, 0.0 }
 0x293   :  { %293 = vadd.xlane.f32.xlu0 %v292_v25 }
 0x299   :  { %v273_v41 = vpop.xlane.xlu1 %272 }
 0x29a   :  { %v274_v42 = vmul.f32 %v273_v41, %v260_v40  ;;  %v430_v40 = vld [vmem:[%s1424_s9 + $0x50] sm:$0xff]  ;;  %v431_v41 = vld [vmem:[%s1424_s9 + $0x58] sm:$0xff] }
 0x320   :  { %v294_v50 = vpop.xlane.xlu0 %293 }
 0x342   :  { %v254_v43 = vpop.f32.mrb[0].mxu0 }
 0x343   :  { %v275_v44 = vadd.f32 %v274_v42, %v254_v43  ;;  %v798_v45 = vpop.f32.mrb[1].mxu0  ;;  %v894_v42 = vpack.c.bf16 %v431_v41, %v430_v40  ;;  %v432_v43 = vld [vmem:[%s1424_s9 + $0x60] sm:$0xff] }
 0x344   :  { %v257_v46 = vpop.f32.mrb[2].mxu0 }
 0x345   :  { %276 = vst.msk [vmem:[#allocation4] sm:$0xff] %vm75_vm0, %v275_v44  ;;  %v799_v47 = vpop.f32.mrb[3].mxu0  ;;  %v433_v44 = vld [vmem:[%s1424_s9 + $0x68] sm:$0xff]  ;;  %895 = vmatpush3.bf16.msra.mxu0 %v894_v42  ;;  %v434_v46 = vld [vmem:[%s1424_s9 + $0x70] sm:$0xff] }
 0x346   :  { %v897_v45 = vpack.c.bf16 %v433_v44, %v432_v43  ;;  %896 = vmatprep.subr.bf16.mxu0 %v1043_v39  ;;  %v435_v47 = vld [vmem:[%s1424_s9 + $0x78] sm:$0xff] }
 0x347   :  { %v900_v48 = vpack.c.bf16 %v435_v47, %v434_v46 }
 0x349   :  { %898 = vmatpush3.bf16.msra.mxu0 %v897_v45 }
 0x34a   :  { %899 = vmatprep.subr.bf16.mxu0 %v1043_v39 }
 0x34c   :  { %v283_v51 = vld [vmem:[#allocation4] sm:$0xff] }
 0x34d   :  { %v295_v53 = vmul.f32 %v294_v50, %v283_v51  ;;  %901 = vmatpush3.bf16.msra.mxu0 %v900_v48  ;;  %v510_v50 = vld [vmem:[#allocation6 + $0x18] sm:$0xff] }
 0x34e   :  { %v902_v51 = vpack.c.bf16 %v510_v50, %v508_v49 }
 0x34f   :  { %746 = vmatmul.mubr.msk.f32.vlgmr.msra.gmra.mrb[0].mxu1 %vm75_vm0, %v295_v53 }
 0x350   :  { %908 = vmatpush3.bf16.msra.mxu1 %v907_v52  ;;  %867 = vmatprep.mubr.msk.f32.mxu1 %vm1042_vm5, %v1039_v1 }
 0x351   :  { %909 = vmatprep.subr.bf16.mxu1 %v1043_v39  ;;  %903 = vmatprep.subr.bf16.mxu0 %v902_v51 }
 0x354   :  { %911 = vmatpush3.bf16.msra.mxu1 %v910_v56 }
 0x355   :  { %912 = vmatprep.subr.bf16.mxu1 %v1043_v39 }
 0x358   :  { %914 = vmatpush3.bf16.msra.mxu1 %v913_v59 }
 0x359   :  { %915 = vmatprep.subr.bf16.mxu1 %v1043_v39 }
 0x35c   :  { %917 = vmatpush3.bf16.msra.mxu1 %v916_v62  ;;  %v748_v62 = vld [vmem:[%s1423_s8] ss:$0 sm:$0xff]  ;;  %s728_s8 = sshll.u32 %s1044_s7, 4  ;;  %s729_s8 = int_to_ptr.vmem [resolvable:$true] %s728_s8 }
 0x35d   :  { %918 = vmatprep.subr.bf16.mxu1 %v1043_v39  ;;  %s986_s18 = scalar_lea.vmem %s729_s8, 128  ;;  %p991_p9 = scmp.lt.s32.totalorder %s729_s8, %s729_s8 }
 0x35e   :  { %p987_p8 = scmp.ne.s32.totalorder %s729_s8, %s986_s18  ;;  %p992_p10 = scmp.lt.s32.totalorder %s986_s18, %s986_s18 }
 0x360   :  { %920 = vmatpush3.bf16.msra.mxu1 %v919_v2  ;;  %v509_v2 = vld [vmem:[#allocation6 + $0x10] sm:$0xff]  ;;  %p993_p11 = por %p992_p10, %p991_p9 }
 0x361   :  { %921 = vmatprep.subr.bf16.mxu1 %v1043_v39  ;;  %v904_v5 = vpack.c.bf16 %v509_v2, %v507_v0 }
 0x362   :  { %p994_p12 = pnand %p993_p11, %p987_p8 }
 0x364   :  { %923 = vmatpush3.bf16.msra.mxu1 %v922_v8 }
 0x365   :  { %924 = vmatprep.subr.bf16.mxu1 %v1043_v39 }
 0x368   :  { %926 = vmatpush3.bf16.msra.mxu1 %v925_v11 }
 0x369   :  { %927 = vmatprep.subr.bf16.mxu1 %v1043_v39 }
 0x36c   :  { %929 = vmatpush3.bf16.msra.mxu1 %v928_v14 }
 0x422   :  { %v385_v19 = vpop.f32.mrb[0].mxu1 }
 0x423   :  { %v386_v20 = vadd.f32 %v385_v19, %v309_v17  ;;  %v387_v22 = vpop.f32.mrb[1].mxu1 }
 0x424   :  { %v388_v23 = vadd.f32 %v387_v22, %v313_v18 }
 0x425   :  { %390 = vadd.xlane.f32.xlu0 %v386_v20  ;;  %v393_v25 = vmul.f32 %v386_v20, %v386_v20 }
 0x426   :  { %v611_v24 = vmax.f32 %v388_v23, 0.0 }
 0x428   :  { %868 = vmatmul.mubr.f32.vlgmr.msra.gmra.mrb[2].mxu1 %v611_v24 }
 0x429   :  { %394 = vadd.xlane.f32.xlu0 %v393_v25 }
 0x4b2   :  { %v391_v52 = vpop.xlane.xlu0 %390 }
 0x4b3   :  { %v392_v53 = vmul.f32 0.03125, %v391_v52 }
 0x4b5   :  { %v397_v55 = vmul.f32 %v392_v53, %v392_v53  ;;  %v399_v59 = vsub.f32 %v386_v20, %v392_v53 }
 0x4b6   :  { %v395_v54 = vpop.xlane.xlu0 %394 }
 0x4b7   :  { %v396_v56 = vmul.f32 0.03125, %v395_v54 }
 0x4b9   :  { %v398_v57 = vsub.f32 %v396_v56, %v397_v55 }
 0x4bb   :  { %v400_v58 = vadd.f32 1e-05, %v398_v57 }
 0x4bd   :  { %950 = vrsqrt.f32 %v400_v58 }
 0x4c7   :  { %v951_v60 = vpop.eup %950 }
 0x4c8   :  { %v402_v39 = vmul.f32 %v951_v60, %v399_v59 }
 0x4ca   :  { %v410_v63 = vmul.f32 %v747_v61, %v402_v39 }
 0x4cc   :  { %v418_v4 = vadd.f32 %v748_v62, %v410_v63 }
 0x4ce   :  { %v419_v8 = vmax.f32 %v418_v4, 0.0 }
 0x4d0   :  { %833 = vmatmul.mubr.f32.vlgmr.msra.gmra.mrb[4].mxu0 %v419_v8 }
 0x4d1   :  { %905 = vmatpush1.bf16.msra.mxu0 %v904_v5  ;;  %590 = vmatprep.mubr.f32.mxu0 %v1039_v1 }
 0x4fb   :  { %v701_v10 = vpop.f32.mrb[2].mxu1 }
 0x4fc   :  { %v702_v11 = vadd.f32 %v752_v9, %v701_v10  ;;  %v869_v12 = vpop.f32.mrb[3].mxu1 }
 0x4fe   :  { %v753_v13 = vmul.f32 -1.442695, %v702_v11 }
 0x500   :  { %952 = vpow2.f32 %v753_v13 }
 0x50a   :  { %v953_v14 = vpop.eup %952 }
 0x50b   :  { %v708_v6 = vadd.f32 1.0, %v953_v14 }
 0x50d   :  { %954 = vrcp.f32 %v708_v6 }
 0x517   :  { %v955_v15 = vpop.eup %954 }
 0x518   :  { %711 = vst [vmem:[#allocation10] sm:$0xff] %v955_v15 }
 0x5a3   :  { %v502_v3 = vpop.f32.mrb[4].mxu0 }
 0x5a4   :  { %v506_v7 = vmax.f32 %v502_v3, 0.0  ;;  %v834_v17 = vpop.f32.mrb[5].mxu0 }
 0x5a6   :  { %749 = vmatmul.mubr.msk.f32.vlgmr.msra.gmra.mrb[6].mxu0 %vm216_vm7, %v506_v7 }
 0x5a7   :  { %997 = shalt.err (!%p994_p12)
}
 0x5a8   :  { %s998_s2 = scalar_lea.hbm %s1430_s15, 128 }
 0x5a9   :  { %p999_p13 = scmp.ne.s32.totalorder %s1430_s15, %s998_s2  ;;  %p1002_p0 = scmp.lt.u32.totalorder %s998_s2, %s1430_s15 }
 0x5ab   :  { %p1004_p1 = pnand %p1002_p0, %p999_p13 }
 0x5ad   :  { %1007 = shalt.err (!%p1004_p1)
}
 0x5ae   :  { %731 = dma.vmem_to_hbm [thread:$0]  %s729_s8, 128, %s1430_s15, [#allocation11]   ;;  %v511_v1 = vld [vmem:[%s1426_s11] sm:$0x3] }
 0x5af   :  { %v516_v18 = vrot.slane %v511_v1, %v1183_v37  ;;  %v520_v19 = vrot.slane %v511_v1, %v312_v16  ;;  %s1045_s11 = smov [#allocation9]  }
 0x5b0   :  { %s718_s15 = sshll.u32 %s1045_s11, 4  ;;  %s719_s15 = int_to_ptr.vmem [resolvable:$true] %s718_s15 }
 0x5b1   :  { %s1008_s25 = scalar_lea.vmem %s719_s15, 256  ;;  %p1013_p3 = scmp.lt.s32.totalorder %s719_s15, %s719_s15 }
 0x5b2   :  { %p1009_p2 = scmp.ne.s32.totalorder %s719_s15, %s1008_s25  ;;  %p1014_p4 = scmp.lt.s32.totalorder %s1008_s25, %s1008_s25 }
 0x5b4   :  { %p1015_p5 = por %p1014_p4, %p1013_p3 }
 0x5b6   :  { %p1016_p6 = pnand %p1015_p5, %p1009_p2 }
 0x679   :  { %v592_v20 = vpop.f32.mrb[6].mxu0 }
 0x67a   :  { %v593_v22 = vadd.f32 %v592_v20, %v516_v18  ;;  %v594_v23 = vpop.f32.mrb[7].mxu0 }
 0x67b   :  { %v595_v24 = vadd.f32 %v594_v23, %v520_v19 }
 0x67c   :  { %v750_v25 = vmul.f32 -1.442695, %v593_v22 }
 0x67d   :  { %v751_v26 = vmul.f32 -1.442695, %v595_v24 }
 0x67e   :  { %956 = vpow2.f32 %v750_v25 }
 0x67f   :  { %958 = vpow2.f32 %v751_v26 }
 0x688   :  { %v957_v27 = vpop.eup %956 }
 0x689   :  { %v959_v28 = vpop.eup %958  ;;  %v603_v29 = vadd.f32 1.0, %v957_v27 }
 0x68a   :  { %v604_v21 = vadd.f32 1.0, %v959_v28 }
 0x68b   :  { %960 = vrcp.f32 %v603_v29 }
 0x68c   :  { %962 = vrcp.f32 %v604_v21 }
 0x695   :  { %v961_v37 = vpop.eup %960 }
 0x696   :  { %v963_v33 = vpop.eup %962  ;;  %609 = vst [vmem:[#allocation9] sm:$0xff] %v961_v37 }
 0x697   :  { %610 = vst [vmem:[#allocation9 + $0x8] sm:$0xff] %v963_v33 }
 0x698   :  { %1019 = shalt.err (!%p1016_p6)
}
 0x699   :  { %s1020_s27 = scalar_lea.hbm %s1429_s14, 256 }
 0x69a   :  { %p1021_p7 = scmp.ne.s32.totalorder %s1429_s14, %s1020_s27  ;;  %p1024_p8 = scmp.lt.u32.totalorder %s1020_s27, %s1429_s14 }
 0x69c   :  { %p1026_p9 = pnand %p1024_p8, %p1021_p7 }
 0x69e   :  { %1029 = shalt.err (!%p1026_p9)
}
 0x69f   :  { %721 = dma.vmem_to_hbm [thread:$0]  %s719_s15, 256, %s1429_s14, [#allocation8]  }
 0x6a0   :  { %1032 = dma.done.wait [#allocation8], 256  }
 0x6a1   :  { %1033 = vsyncadd [#allocation8], 4294967040 }
 0x6a2   :  { %1034 = dma.done.wait [#allocation11], 128  }
 0x6a3   :  { %1035 = vsyncadd [#allocation11], 4294967168 }
 0x6a4   :  { %738 = vsyncpa [#allocation7], 1 }
 0x6a5   :  { %739 = vsyncpa [#allocation8], 1 }
 0x6a6   :  { %740 = vsyncpa [#allocation11], 1 }

</bundles_post_ra>
